<compile_context>
chip_gen: v7x
topology: tpu7x:2x2x1
jax: 0.10.0
libtpu: 0.0.40
codegen_flags: <defaults>
</compile_context>

<pallas_src>
import jax
import jax.numpy as jnp
from jax.experimental import pallas as pl
from jax.experimental.pallas import tpu as pltpu

LANE = 128        # lane width (last-dim alignment for the padded hidden dim)
SUBLANE = 8       # sublane width (second-to-last dim alignment)
MAX_TB = 1024     # max batch-tile rows (per perf review: 512 -> 1024)
SMALL_B = 256     # below this, use a single grid step (latency-bound regime)


def _round_up(x, m):
    return (x + m - 1) // m * m


def _qnet_kernel(x_ref, w1_ref, b1_ref, w2_ref, b2_ref, out_ref):
    # Cast activations to bf16 in-kernel (VPU), hidden layer on the MXU with
    # f32 accumulation, bias + ReLU in f32.
    x = x_ref[...].astype(jnp.bfloat16)
    h = jnp.dot(x, w1_ref[...], preferred_element_type=jnp.float32)
    h = jnp.maximum(h + b1_ref[...], 0.0)
    # Output layer: bf16 x bf16 -> f32 accumulation, true-width result.
    y = jnp.dot(h.astype(jnp.bfloat16), w2_ref[...],
                preferred_element_type=jnp.float32)
    out_ref[...] = (y + b2_ref[...]).astype(out_ref.dtype)


def prepare_params(w1, b1, w2, b2):
    """One-time parameter preparation (hoisted out of the per-call hot path).

    PyTorch nn.Linear layout in:
      w1 : (hidden, in)   f32
      b1 : (hidden,)      f32
      w2 : (out, hidden)  f32
      b2 : (out,)         f32

    Stored layout out (matmul-ready, VMEM-friendly):
      w1 : (in,      hid_p) bf16   (hid_p = hidden rounded up to 128)
      b1 : (1,       hid_p) f32
      w2 : (hid_p,   out)   bf16
      b2 : (1,       out)   f32
    """
    hidden, in_size = w1.shape
    out_size = w2.shape[0]
    hid_p = _round_up(hidden, LANE)

    w1_t = jnp.zeros((in_size, hid_p), jnp.float32).at[:, :hidden].set(w1.T)
    b1_2d = jnp.zeros((1, hid_p), jnp.float32).at[0, :hidden].set(b1)
    w2_t = jnp.zeros((hid_p, out_size), jnp.float32).at[:hidden, :].set(w2.T)
    b2_2d = b2.reshape(1, out_size).astype(jnp.float32)

    return {
        "w1": w1_t.astype(jnp.bfloat16),
        "b1": b1_2d,
        "w2": w2_t.astype(jnp.bfloat16),
        "b2": b2_2d,
    }


@jax.jit
def _forward_impl(x, w1, b1, w2, b2):
    B, in_size = x.shape
    hid_p = w1.shape[1]
    out_size = w2.shape[1]

    # Batch tile selection:
    #  * small B  -> one grid step (no per-step overhead, pure latency path)
    #  * large B  -> >=4 grid steps so v7x's two TensorCores both get work,
    #                capped at MAX_TB rows per tile.
    if B <= SMALL_B:
        tb = _round_up(max(B, 1), SUBLANE)
    else:
        tb = min(MAX_TB, _round_up(pl.cdiv(B, 4), SUBLANE))

    grid = (pl.cdiv(B, tb),)

    return pl.pallas_call(
        _qnet_kernel,
        out_shape=jax.ShapeDtypeStruct((B, out_size), jnp.float32),
        grid=grid,
        in_specs=[
            # x streams through the pipeline, one batch tile per grid step.
            # Last dim == full array dim -> legal without 128-lane padding.
            pl.BlockSpec((tb, in_size), lambda i: (i, 0)),
            # Weights / biases: same block every step -> stay VMEM-resident.
            pl.BlockSpec((in_size, hid_p), lambda i: (0, 0)),
            pl.BlockSpec((1, hid_p), lambda i: (0, 0)),
            pl.BlockSpec((hid_p, out_size), lambda i: (0, 0)),
            pl.BlockSpec((1, out_size), lambda i: (0, 0)),
        ],
        # True-width output: last dim == full array dim -> legal, minimal
        # writeback bytes, no post-kernel slice.
        out_specs=pl.BlockSpec((tb, out_size), lambda i: (i, 0)),
        compiler_params=pltpu.CompilerParams(
            dimension_semantics=("parallel",),   # shard batch tiles across TCs
        ),
    )(x, w1, b1, w2, b2)


def linear_qnet_forward(x, params):
    """Forward pass of Linear_QNet given prepared params.

    x : (B, input_size) float32 -> (B, output_size) float32
    """
    return _forward_impl(x, params["w1"], params["b1"], params["w2"],
                         params["b2"])


def init_params(key, input_size, hidden_size, output_size):
    """nn.Linear-style uniform(-1/sqrt(fan_in), 1/sqrt(fan_in)) init (PyTorch layout)."""
    k1, k2, k3, k4 = jax.random.split(key, 4)
    bound1 = 1.0 / jnp.sqrt(jnp.float32(input_size))
    bound2 = 1.0 / jnp.sqrt(jnp.float32(hidden_size))
    w1 = jax.random.uniform(k1, (hidden_size, input_size), jnp.float32, -bound1, bound1)
    b1 = jax.random.uniform(k2, (hidden_size,), jnp.float32, -bound1, bound1)
    w2 = jax.random.uniform(k3, (output_size, hidden_size), jnp.float32, -bound2, bound2)
    b2 = jax.random.uniform(k4, (output_size,), jnp.float32, -bound2, bound2)
    return w1, b1, w2, b2


if __name__ == "__main__":
    # Small shapes consistent with the module (tiny Q-network MLP).
    batch, input_size, hidden_size, output_size = 8, 16, 32, 4

    key = jax.random.PRNGKey(0)
    kx, kp = jax.random.split(key)
    x = jax.random.normal(kx, (batch, input_size), jnp.float32)
    w1, b1, w2, b2 = init_params(kp, input_size, hidden_size, output_size)

    params = prepare_params(w1, b1, w2, b2)   # one-time prep (transpose/pad/bf16)

    out = jax.block_until_ready(linear_qnet_forward(x, params))

    # Pure-JAX f32 reference (bf16 MXU inputs -> relaxed tolerance).
    ref = jnp.maximum(x @ w1.T + b1, 0.0) @ w2.T + b2
    assert out.shape == (batch, output_size)
    assert jnp.allclose(out, ref, atol=5e-2, rtol=5e-2), \
        f"max abs err = {jnp.max(jnp.abs(out - ref))}"

    # Exercise the multi-step / ragged-last-block path too.
    big_B = 1100
    xb = jax.random.normal(jax.random.PRNGKey(1), (big_B, input_size), jnp.float32)
    out_big = jax.block_until_ready(linear_qnet_forward(xb, params))
    ref_big = jnp.maximum(xb @ w1.T + b1, 0.0) @ w2.T + b2
    assert out_big.shape == (big_B, output_size)
    assert jnp.allclose(out_big, ref_big, atol=5e-2, rtol=5e-2), \
        f"max abs err (big) = {jnp.max(jnp.abs(out_big - ref_big))}"

    print("KERNEL_OK")
</pallas_src>

<mosaic_0001>
module attributes {stable_mosaic.version = 11 : i64} {
  func.func @_qnet_kernel(%arg0: i32, %arg1: memref<8x16xf32, #tpu.memory_space<vmem>>, %arg2: memref<16x128xbf16, #tpu.memory_space<vmem>>, %arg3: memref<1x128xf32, #tpu.memory_space<vmem>>, %arg4: memref<128x4xbf16, #tpu.memory_space<vmem>>, %arg5: memref<1x4xf32, #tpu.memory_space<vmem>>, %arg6: memref<8x4xf32, #tpu.memory_space<vmem>>) attributes {dimension_semantics = [#tpu.dimension_semantics<parallel>], iteration_bounds = array<i64: 1>, scalar_prefetch = 0 : i64, scratch_operands = 0 : i64, tpu.core_type = #tpu.core_type<tc>, window_params = [{transform_indices = @transform_0, window_bounds = array<i64: 8, 16>}, {pipeline_mode = #tpu.pipeline_mode<synchronous>, transform_indices = @transform_1, window_bounds = array<i64: 16, 128>}, {pipeline_mode = #tpu.pipeline_mode<synchronous>, transform_indices = @transform_2, window_bounds = array<i64: 1, 128>}, {pipeline_mode = #tpu.pipeline_mode<synchronous>, transform_indices = @transform_3, window_bounds = array<i64: 128, 4>}, {pipeline_mode = #tpu.pipeline_mode<synchronous>, transform_indices = @transform_4, window_bounds = array<i64: 1, 4>}, {transform_indices = @transform_5, window_bounds = array<i64: 8, 4>}]} {
    %c0 = arith.constant 0 : index
    %c0_0 = arith.constant 0 : index
    %0 = vector.load %arg1[%c0, %c0_0] : memref<8x16xf32, #tpu.memory_space<vmem>>, vector<8x16xf32>
    %1 = arith.truncf %0 : vector<8x16xf32> to vector<8x16xbf16>
    %c0_1 = arith.constant 0 : index
    %c0_2 = arith.constant 0 : index
    %2 = vector.load %arg2[%c0_1, %c0_2] : memref<16x128xbf16, #tpu.memory_space<vmem>>, vector<16x128xbf16>
    %cst = arith.constant dense<0.000000e+00> : vector<8x128xf32>
    %3 = tpu.matmul %1, %2, %cst {dimension_numbers = #tpu.dot_dimension_numbers<[1], [0], [0], [1], [0, 0, 1, 1], [], []>} : vector<8x16xbf16>, vector<16x128xbf16>, vector<8x128xf32> -> vector<8x128xf32>
    %c0_3 = arith.constant 0 : index
    %c0_4 = arith.constant 0 : index
    %4 = vector.load %arg3[%c0_3, %c0_4] : memref<1x128xf32, #tpu.memory_space<vmem>>, vector<1x128xf32>
    %5 = vector.broadcast %4 : vector<1x128xf32> to vector<8x128xf32>
    %6 = arith.addf %3, %5 : vector<8x128xf32>
    %cst_5 = arith.constant 0.000000e+00 : f32
    %7 = vector.broadcast %cst_5 : f32 to vector<8x128xf32>
    %8 = arith.maximumf %6, %7 : vector<8x128xf32>
    %9 = arith.truncf %8 : vector<8x128xf32> to vector<8x128xbf16>
    %c0_6 = arith.constant 0 : index
    %c0_7 = arith.constant 0 : index
    %10 = vector.load %arg4[%c0_6, %c0_7] : memref<128x4xbf16, #tpu.memory_space<vmem>>, vector<128x4xbf16>
    %cst_8 = arith.constant dense<0.000000e+00> : vector<8x4xf32>
    %11 = tpu.matmul %9, %10, %cst_8 {dimension_numbers = #tpu.dot_dimension_numbers<[1], [0], [0], [1], [0, 0, 1, 1], [], []>} : vector<8x128xbf16>, vector<128x4xbf16>, vector<8x4xf32> -> vector<8x4xf32>
    %c0_9 = arith.constant 0 : index
    %c0_10 = arith.constant 0 : index
    %12 = vector.load %arg5[%c0_9, %c0_10] : memref<1x4xf32, #tpu.memory_space<vmem>>, vector<1x4xf32>
    %13 = vector.broadcast %12 : vector<1x4xf32> to vector<8x4xf32>
    %14 = arith.addf %11, %13 : vector<8x4xf32>
    %c0_11 = arith.constant 0 : index
    %c0_12 = arith.constant 0 : index
    %15 = vector.load %arg6[%c0_11, %c0_12] : memref<8x4xf32, #tpu.memory_space<vmem>>, vector<8x4xf32>
    tpu.vector_store %arg6[%c0_11, %c0_12], %14 {strides = array<i32>} : memref<8x4xf32, #tpu.memory_space<vmem>>, vector<8x4xf32>,
    return
  }
  func.func @transform_0(%arg0: i32) -> (i32, i32) {
    %c0_i32 = arith.constant 0 : i32
    %c0_i32_0 = arith.constant 0 : i32
    return %arg0, %c0_i32 : i32, i32
  }
  func.func @transform_1(%arg0: i32) -> (i32, i32) {
    %c0_i32 = arith.constant 0 : i32
    %c0_i32_0 = arith.constant 0 : i32
    %c0_i32_1 = arith.constant 0 : i32
    return %c0_i32, %c0_i32_0 : i32, i32
  }
  func.func @transform_2(%arg0: i32) -> (i32, i32) {
    %c0_i32 = arith.constant 0 : i32
    %c0_i32_0 = arith.constant 0 : i32
    %c0_i32_1 = arith.constant 0 : i32
    return %c0_i32, %c0_i32_0 : i32, i32
  }
  func.func @transform_3(%arg0: i32) -> (i32, i32) {
    %c0_i32 = arith.constant 0 : i32
    %c0_i32_0 = arith.constant 0 : i32
    %c0_i32_1 = arith.constant 0 : i32
    return %c0_i32, %c0_i32_0 : i32, i32
  }
  func.func @transform_4(%arg0: i32) -> (i32, i32) {
    %c0_i32 = arith.constant 0 : i32
    %c0_i32_0 = arith.constant 0 : i32
    %c0_i32_1 = arith.constant 0 : i32
    return %c0_i32, %c0_i32_0 : i32, i32
  }
  func.func @transform_5(%arg0: i32) -> (i32, i32) {
    %c0_i32 = arith.constant 0 : i32
    %c0_i32_0 = arith.constant 0 : i32
    return %arg0, %c0_i32 : i32, i32
  }
}

</mosaic_0001>

<bundles_post_ra>
// kernel: _forward_impl.1
= control target key start
LH: loop header
LB: loop body
LE: loop exit
PB: predicated region body
PF: predicated region fallthrough
CT: control target
= control target key end

     0   :  { %v261_v0 = vmov 0.0   ;;  %vm262_vm0 = vmmov 0   ;;  %vm38_vm1 = vcmask 130048   ;;  %vm195_vm2 = vcmask 31744   ;;  %s332_s1 = inlined_call_operand.vmem [shape: bf16[16,128], index: 1, kind: input, shape index: {}]   ;;  %s333_s0 = inlined_call_operand.vmem [shape: f32[8,16], index: 0, kind: input, shape index: {}]   ;;  %s334_s3 = inlined_call_operand.vmem [shape: bf16[128,4], index: 3, kind: input, shape index: {}]   ;;  %s335_s2 = inlined_call_operand.vmem [shape: f32[1,128], index: 2, kind: input, shape index: {}]   ;;  %s336_s4 = inlined_call_operand.vmem [shape: f32[1,4], index: 4, kind: input, shape index: {}]   ;;  %s337_s5 = inlined_call_operand.vmem [shape: f32[8,4], index: 5, kind: output, shape index: {}]  }
   0x1   :  { %224 = vmatprep.subr.bf16.mxu0 %v261_v0  ;;  %v252_v1 = vld [vmem:[%s332_s1] sm:$0xff]   ;;  %226 = vmatprep.mubr.msk.bf16.mxu0 %vm262_vm0, %v261_v0  ;;  %v254_v5 = vld [vmem:[%s334_s3 + $0x8] sm:$0xff]   ;;  %v255_v6 = vld [vmem:[%s334_s3 + $0x10] sm:$0xff]  }
   0x2   :  { %v21_v2 = vld [vmem:[%s333_s0] sm:$0xff]  ;;  %230 = vmatprep.subr.bf16.mxu1 %v261_v0  ;;  %246 = vmatprep.mubr.msk.bf16.mxu1 %vm262_vm0, %v261_v0  ;;  %v256_v7 = vld [vmem:[%s334_s3 + $0x18] sm:$0xff]   ;;  %v258_v9 = vld [vmem:[%s334_s3 + $0x28] sm:$0xff]  }
   0x3   :  { %225 = vmatpush3.bf16.msra.mxu0 %v252_v1  ;;  %v22_v3 = vpack.c.bf16 %v21_v2, %v21_v2  ;;  %v253_v4 = vld [vmem:[%s334_s3] sm:$0xff]   ;;  %v259_v10 = vld [vmem:[%s334_s3 + $0x30] sm:$0xff]   ;;  %v260_v11 = vld [vmem:[%s334_s3 + $0x38] sm:$0xff]  }
   0x4   :  { %231 = vmatpush3.bf16.msra.mxu1 %v253_v4  ;;  %v257_v8 = vld [vmem:[%s334_s3 + $0x20] sm:$0xff]  }
   0x5   :  { %232 = vmatprep.subr.bf16.mxu1 %v261_v0  ;;  %v201_v12 = vld [vmem:[%s335_s2] ss:$0 sm:$0xff] }
   0x6   :  { %227 = vmatmul.mubr.msk.bf16.vlgmr.msra.gmra.mrb[0].mxu0 %vm38_vm1, %v22_v3  ;;  %v204_v20 = vld [vmem:[%s336_s4] ss:$0 sm:$0xff] }
   0x8   :  { %233 = vmatpush3.bf16.msra.mxu1 %v254_v5 }
   0x9   :  { %234 = vmatprep.subr.bf16.mxu1 %v261_v0 }
   0xc   :  { %235 = vmatpush3.bf16.msra.mxu1 %v255_v6 }
   0xd   :  { %236 = vmatprep.subr.bf16.mxu1 %v261_v0 }
  0x10   :  { %237 = vmatpush3.bf16.msra.mxu1 %v256_v7 }
  0x11   :  { %238 = vmatprep.subr.bf16.mxu1 %v261_v0 }
  0x14   :  { %239 = vmatpush3.bf16.msra.mxu1 %v257_v8 }
  0x15   :  { %240 = vmatprep.subr.bf16.mxu1 %v261_v0 }
  0x18   :  { %241 = vmatpush3.bf16.msra.mxu1 %v258_v9 }
  0x19   :  { %242 = vmatprep.subr.bf16.mxu1 %v261_v0 }
  0x1c   :  { %243 = vmatpush3.bf16.msra.mxu1 %v259_v10 }
  0x1d   :  { %244 = vmatprep.subr.bf16.mxu1 %v261_v0 }
  0x20   :  { %245 = vmatpush3.bf16.msra.mxu1 %v260_v11 }
  0xd9   :  { %v76_v13 = vpop.f32.mrb[0].mxu0 }
  0xda   :  { %v77_v14 = vadd.f32 %v201_v12, %v76_v13  ;;  %v228_v15 = vpop.f32.mrb[1].mxu0 }
  0xdb   :  { %v79_v16 = vpop.f32.mrb[2].mxu0 }
  0xdc   :  { %v82_v17 = vmax.f32 %v77_v14, 0.0  ;;  %v229_v18 = vpop.f32.mrb[3].mxu0 }
  0xde   :  { %v83_v19 = vpack.c.bf16 %v82_v17, %v82_v17 }
  0xe0   :  { %247 = vmatmul.mubr.bf16.vlgmr.msra.gmra.mrb[0].mxu1 %v83_v19 }
 0x1b3   :  { %v189_v21 = vpop.f32.mrb[0].mxu1 }
 0x1b4   :  { %v190_v22 = vadd.f32 %v204_v20, %v189_v21  ;;  %v248_v23 = vpop.f32.mrb[1].mxu1 }
 0x1b5   :  { %v192_v24 = vpop.f32.mrb[2].mxu1 }
 0x1b6   :  { %196 = vst.msk [vmem:[%s337_s5] sm:$0xff] %vm195_vm2, %v190_v22  ;;  %v249_v25 = vpop.f32.mrb[3].mxu1 }

</bundles_post_ra>
